<compile_context>
chip_gen: v7x
topology: tpu7x:2x2x1
jax: 0.10.0
libtpu: 0.0.40
codegen_flags: <defaults>
</compile_context>

<pallas_src>
import functools
import math

import jax
import jax.numpy as jnp
from jax.experimental import pallas as pl
from jax.experimental.pallas import tpu as pltpu


# ---------------- fused Pallas kernel ----------------

def _fused_mha_kernel(x_ref, in_wT_ref, in_b_ref, out_wT_ref, out_b_ref,
                      g_ref, gt_ref, o_ref):
    """Nb batch elements per grid step: QKV proj -> MHA -> out proj, all VMEM-resident.

    x_ref:      (Nb, L, E)  f32
    in_wT_ref:  (E, 3E)     bf16  (Q rows pre-scaled by 1/sqrt(head_dim))
    in_b_ref:   (1, 3E)     f32   (Q part pre-scaled)
    out_wT_ref: (E, E)      bf16
    out_b_ref:  (1, E)      f32
    g_ref:      (E, H)      f32   g[e, h] = 1 iff lane e belongs to head h
    gt_ref:     (H, E)      f32   transpose of g
    o_ref:      (Nb, L, E)
    """
    nb, L, E = x_ref.shape
    H = g_ref.shape[1]

    # ---- QKV projection: one bf16 MXU matmul over all nb*L tokens, f32 accumulation ----
    x = x_ref[...].reshape(nb * L, E).astype(jnp.bfloat16)
    qkv = jnp.dot(x, in_wT_ref[...], preferred_element_type=jnp.float32)
    qkv = qkv + in_b_ref[...]                                   # (nb*L, 3E) f32
    q = qkv[:, :E].reshape(nb, L, E)                            # scale already folded in
    k = qkv[:, E:2 * E].reshape(nb, L, E)
    v = qkv[:, 2 * E:].reshape(nb, L, E)

    # ---- scores: s[b,i,j,h] = sum_{e in head h} q[b,i,e] * k[b,j,e] ----
    # Lane-dense VPU outer product over tokens, then one small MXU matmul with the resident
    # grouping matrix to sum the hd lanes of each head (instead of 32 tiny head matmuls).
    t = q[:, :, None, :] * k[:, None, :, :]                     # (nb, Lq, Lk, E) f32
    s = jnp.dot(t.reshape(nb * L * L, E), g_ref[...],
                preferred_element_type=jnp.float32)
    s = s.reshape(nb, L, L, H)                                  # (nb, Lq, Lk, H)

    # ---- softmax over keys (axis=2); denominator once per row via EUP reciprocal ----
    m = jnp.max(s, axis=2, keepdims=True)
    p = jnp.exp(s - m)
    l = jnp.sum(p, axis=2, keepdims=True)
    p = p * pl.reciprocal(l, approx=True)

    # ---- P @ V: expand head weights back onto lanes, lane-dense VPU MAC over keys ----
    pe = jnp.dot(p.reshape(nb * L * L, H), gt_ref[...],
                 preferred_element_type=jnp.float32).reshape(nb, L, L, E)
    attn = jnp.sum(pe * v[:, None, :, :], axis=2)               # (nb, L, E), lane-dense

    # ---- output projection (bf16 MXU, f32 accumulation) ----
    out = jnp.dot(attn.reshape(nb * L, E).astype(jnp.bfloat16), out_wT_ref[...],
                  preferred_element_type=jnp.float32)
    out = out + out_b_ref[...]
    o_ref[...] = out.reshape(nb, L, E).astype(o_ref.dtype)      # lane-dense store


# ---------------- one-time parameter preparation (outside jit) ----------------

def prepare_params(in_w, in_b, out_w, out_b, num_heads):
    """Transpose weights to lane-major layout, fold 1/sqrt(head_dim) into the Q projection,
    cast MXU operands to bf16, and build the resident head-grouping matrices."""
    three_e, E = in_w.shape
    assert three_e == 3 * E and E % num_heads == 0
    hd = E // num_heads
    scale = 1.0 / math.sqrt(hd)                      # power of two here -> exact in bf16

    in_w_s = in_w.at[:E].multiply(scale)             # fold scale into Q rows
    in_b_s = in_b.at[:E].multiply(scale)

    in_wT = jnp.asarray(in_w_s.T, dtype=jnp.bfloat16)            # (E, 3E)
    in_b2 = jnp.asarray(in_b_s.reshape(1, 3 * E), jnp.float32)   # (1, 3E)
    out_wT = jnp.asarray(out_w.T, dtype=jnp.bfloat16)            # (E, E)
    out_b2 = jnp.asarray(out_b.reshape(1, E), jnp.float32)       # (1, E)

    # g[e, h] = 1 iff lane e belongs to head h (e // hd == h); gt is its transpose.
    g = jnp.repeat(jnp.eye(num_heads, dtype=jnp.float32), hd, axis=0)   # (E, H)
    gt = jnp.asarray(g.T)                                                # (H, E)
    return in_wT, in_b2, out_wT, out_b2, g, gt


def _tensorcores_per_device():
    """Best-effort TensorCore count per JAX device (for the generation-conditional grid)."""
    try:
        kind = jax.devices()[0].device_kind.lower()
    except Exception:
        return 1
    # v4 / v5p megacore and v7x expose 2 TensorCores per device; v5e / v6e have 1.
    if any(tag in kind for tag in ("v4", "v5p", "v7", "7x")):
        return 2
    return 1


# ---------------- wrapper ----------------

@functools.partial(jax.jit, static_argnames=("num_blocks",))
def fuse_slice_layer(x, params, *, num_blocks=1):
    """Eval-mode self-attention matching nn.MultiheadAttention(E, num_heads).

    x: (L, N, E); params from prepare_params(). Returns (L, N, E).
    num_blocks: number of grid steps over the batch (1 on 1-TC chips, 2 on 2-TC chips).
    """
    in_wT, in_b2, out_wT, out_b2, g, gt = params
    L, N, E = x.shape
    H = g.shape[1]
    assert N % num_blocks == 0
    nb = N // num_blocks

    # Batch-major, lane-dense (N, L, E) view for clean (Nb, L, E) blocks.
    # TODO(synk): make (N, L, E) the canonical layout in the surrounding model to drop this glue.
    x_nle = jnp.transpose(x, (1, 0, 2))

    out_nle = pl.pallas_call(
        _fused_mha_kernel,
        out_shape=jax.ShapeDtypeStruct((N, L, E), x.dtype),
        grid=(num_blocks,),
        in_specs=[
            pl.BlockSpec((nb, L, E), lambda n: (n, 0, 0)),       # per-block activations
            pl.BlockSpec((E, 3 * E), lambda n: (0, 0)),          # resident weights (bf16)
            pl.BlockSpec((1, 3 * E), lambda n: (0, 0)),
            pl.BlockSpec((E, E), lambda n: (0, 0)),
            pl.BlockSpec((1, E), lambda n: (0, 0)),
            pl.BlockSpec((E, H), lambda n: (0, 0)),              # resident grouping matrices
            pl.BlockSpec((H, E), lambda n: (0, 0)),
        ],
        out_specs=pl.BlockSpec((nb, L, E), lambda n: (n, 0, 0)),
        compiler_params=pltpu.CompilerParams(
            dimension_semantics=("parallel",)),                  # shards batch across TCs
    )(x_nle, in_wT, in_b2, out_wT, out_b2, g, gt)

    return jnp.transpose(out_nle, (1, 0, 2))                     # back to (L, N, E)


# ---------------- pure-JAX reference (eval-mode nn.MultiheadAttention) ----------------

def _reference(x, in_w, in_b, out_w, out_b, num_heads):
    L, N, E = x.shape
    hd = E // num_heads
    qkv = x @ in_w.T + in_b
    q, k, v = jnp.split(qkv, 3, axis=-1)

    def to_heads(t):
        return jnp.transpose(t.reshape(L, N, num_heads, hd), (1, 2, 0, 3))

    q, k, v = to_heads(q), to_heads(k), to_heads(v)
    s = jnp.einsum("nhqd,nhkd->nhqk", q, k) / math.sqrt(hd)
    p = jax.nn.softmax(s, axis=-1)
    o = jnp.einsum("nhqk,nhkd->nhqd", p, v)
    o = jnp.transpose(o, (2, 0, 1, 3)).reshape(L, N, E)
    return o @ out_w.T + out_b


# ---------------- main ----------------

if __name__ == "__main__":
    L, N, E, H = 8, 2, 128, 32   # emb_dim=128, 32 heads -> head_dim=4

    key = jax.random.PRNGKey(0)
    k1, k2, k3, k4, k5 = jax.random.split(key, 5)
    x = jax.random.normal(k1, (L, N, E), jnp.float32)

    # Deterministic synthetic parameters (shapes match nn.MultiheadAttention(E, 32)).
    in_w = jax.random.normal(k2, (3 * E, E), jnp.float32) * (1.0 / math.sqrt(E))
    in_b = jax.random.normal(k3, (3 * E,), jnp.float32) * 0.01
    out_w = jax.random.normal(k4, (E, E), jnp.float32) * (1.0 / math.sqrt(E))
    out_b = jax.random.normal(k5, (E,), jnp.float32) * 0.01

    params = prepare_params(in_w, in_b, out_w, out_b, H)         # one-time, outside jit

    num_blocks = _tensorcores_per_device()
    if N % num_blocks != 0:
        num_blocks = 1

    y = fuse_slice_layer(x, params, num_blocks=num_blocks)
    y = jax.block_until_ready(y)

    with jax.default_matmul_precision("float32"):                # exact-f32 baseline
        y_ref = _reference(x, in_w, in_b, out_w, out_b, H)

    assert y.shape == (L, N, E)
    # Tolerance relaxed because (per perf review) the projection MXU operands are bf16
    # (f32 accumulation) and the softmax denominator uses pl.reciprocal(approx=True).
    assert jnp.allclose(y, y_ref, atol=4e-2, rtol=4e-2), "mismatch vs pure-JAX reference"

    print("KERNEL_OK")
</pallas_src>

<mosaic_0001>
module attributes {stable_mosaic.version = 11 : i64} {
  func.func @_fused_mha_kernel(%arg0: i32, %arg1: memref<2x8x128xf32, #tpu.memory_space<vmem>>, %arg2: memref<128x384xbf16, #tpu.memory_space<vmem>>, %arg3: memref<1x384xf32, #tpu.memory_space<vmem>>, %arg4: memref<128x128xbf16, #tpu.memory_space<vmem>>, %arg5: memref<1x128xf32, #tpu.memory_space<vmem>>, %arg6: memref<128x32xf32, #tpu.memory_space<vmem>>, %arg7: memref<32x128xf32, #tpu.memory_space<vmem>>, %arg8: memref<2x8x128xf32, #tpu.memory_space<vmem>>) attributes {dimension_semantics = [#tpu.dimension_semantics<parallel>], iteration_bounds = array<i64: 1>, scalar_prefetch = 0 : i64, scratch_operands = 0 : i64, tpu.core_type = #tpu.core_type<tc>, window_params = [{transform_indices = @transform_0, window_bounds = array<i64: 2, 8, 128>}, {pipeline_mode = #tpu.pipeline_mode<synchronous>, transform_indices = @transform_1, window_bounds = array<i64: 128, 384>}, {pipeline_mode = #tpu.pipeline_mode<synchronous>, transform_indices = @transform_2, window_bounds = array<i64: 1, 384>}, {pipeline_mode = #tpu.pipeline_mode<synchronous>, transform_indices = @transform_3, window_bounds = array<i64: 128, 128>}, {pipeline_mode = #tpu.pipeline_mode<synchronous>, transform_indices = @transform_4, window_bounds = array<i64: 1, 128>}, {pipeline_mode = #tpu.pipeline_mode<synchronous>, transform_indices = @transform_5, window_bounds = array<i64: 128, 32>}, {pipeline_mode = #tpu.pipeline_mode<synchronous>, transform_indices = @transform_6, window_bounds = array<i64: 32, 128>}, {transform_indices = @transform_7, window_bounds = array<i64: 2, 8, 128>}]} {
    %c0 = arith.constant 0 : index
    %c0_0 = arith.constant 0 : index
    %c0_1 = arith.constant 0 : index
    %0 = vector.load %arg1[%c0, %c0_0, %c0_1] : memref<2x8x128xf32, #tpu.memory_space<vmem>>, vector<2x8x128xf32>
    %1 = vector.shape_cast %0 : vector<2x8x128xf32> to vector<16x128xf32>
    %2 = arith.truncf %1 : vector<16x128xf32> to vector<16x128xbf16>
    %c0_2 = arith.constant 0 : index
    %c0_3 = arith.constant 0 : index
    %3 = vector.load %arg2[%c0_2, %c0_3] : memref<128x384xbf16, #tpu.memory_space<vmem>>, vector<128x384xbf16>
    %cst = arith.constant dense<0.000000e+00> : vector<16x384xf32>
    %4 = tpu.matmul %2, %3, %cst {dimension_numbers = #tpu.dot_dimension_numbers<[1], [0], [0], [1], [0, 0, 1, 1], [], []>} : vector<16x128xbf16>, vector<128x384xbf16>, vector<16x384xf32> -> vector<16x384xf32>
    %c0_4 = arith.constant 0 : index
    %c0_5 = arith.constant 0 : index
    %5 = vector.load %arg3[%c0_4, %c0_5] : memref<1x384xf32, #tpu.memory_space<vmem>>, vector<1x384xf32>
    %6 = vector.broadcast %5 : vector<1x384xf32> to vector<16x384xf32>
    %7 = arith.addf %4, %6 : vector<16x384xf32>
    %8 = vector.extract_strided_slice %7 {offsets = [0, 0], sizes = [16, 128], strides = [1, 1]} : vector<16x384xf32> to vector<16x128xf32>
    %9 = vector.shape_cast %8 : vector<16x128xf32> to vector<2x8x128xf32>
    %10 = vector.extract_strided_slice %7 {offsets = [0, 128], sizes = [16, 128], strides = [1, 1]} : vector<16x384xf32> to vector<16x128xf32>
    %11 = vector.shape_cast %10 : vector<16x128xf32> to vector<2x8x128xf32>
    %12 = vector.extract_strided_slice %7 {offsets = [0, 256], sizes = [16, 128], strides = [1, 1]} : vector<16x384xf32> to vector<16x128xf32>
    %13 = vector.shape_cast %12 : vector<16x128xf32> to vector<2x8x128xf32>
    %14 = vector.shape_cast %9 : vector<2x8x128xf32> to vector<2x8x1x128xf32>
    %15 = vector.shape_cast %11 : vector<2x8x128xf32> to vector<2x1x8x128xf32>
    %16 = vector.broadcast %14 : vector<2x8x1x128xf32> to vector<2x8x8x128xf32>
    %17 = vector.broadcast %15 : vector<2x1x8x128xf32> to vector<2x8x8x128xf32>
    %18 = arith.mulf %16, %17 : vector<2x8x8x128xf32>
    %19 = vector.shape_cast %18 : vector<2x8x8x128xf32> to vector<128x128xf32>
    %c0_6 = arith.constant 0 : index
    %c0_7 = arith.constant 0 : index
    %20 = vector.load %arg6[%c0_6, %c0_7] : memref<128x32xf32, #tpu.memory_space<vmem>>, vector<128x32xf32>
    %cst_8 = arith.constant dense<0.000000e+00> : vector<128x32xf32>
    %21 = tpu.matmul %19, %20, %cst_8 {dimension_numbers = #tpu.dot_dimension_numbers<[1], [0], [0], [1], [0, 0, 1, 1], [], []>} : vector<128x128xf32>, vector<128x32xf32>, vector<128x32xf32> -> vector<128x32xf32>
    %22 = vector.shape_cast %21 : vector<128x32xf32> to vector<2x8x8x32xf32>
    %cst_9 = arith.constant dense<0xFF800000> : vector<2x8x32xf32>
    %23 = vector.multi_reduction <maximumf>, %22, %cst_9 [2] : vector<2x8x8x32xf32> to vector<2x8x32xf32>
    %24 = vector.shape_cast %23 : vector<2x8x32xf32> to vector<2x8x1x32xf32>
    %25 = vector.broadcast %24 : vector<2x8x1x32xf32> to vector<2x8x8x32xf32>
    %26 = arith.subf %22, %25 : vector<2x8x8x32xf32>
    %27 = math.exp %26 : vector<2x8x8x32xf32>
    %cst_10 = arith.constant dense<0.000000e+00> : vector<2x8x32xf32>
    %28 = vector.multi_reduction <add>, %27, %cst_10 [2] : vector<2x8x8x32xf32> to vector<2x8x32xf32>
    %29 = vector.shape_cast %28 : vector<2x8x32xf32> to vector<2x8x1x32xf32>
    %30 = tpu.reciprocal %29 {approx = true} : vector<2x8x1x32xf32> -> vector<2x8x1x32xf32>
    %31 = vector.broadcast %30 : vector<2x8x1x32xf32> to vector<2x8x8x32xf32>
    %32 = arith.mulf %27, %31 : vector<2x8x8x32xf32>
    %33 = vector.shape_cast %32 : vector<2x8x8x32xf32> to vector<128x32xf32>
    %c0_11 = arith.constant 0 : index
    %c0_12 = arith.constant 0 : index
    %34 = vector.load %arg7[%c0_11, %c0_12] : memref<32x128xf32, #tpu.memory_space<vmem>>, vector<32x128xf32>
    %cst_13 = arith.constant dense<0.000000e+00> : vector<128x128xf32>
    %35 = tpu.matmul %33, %34, %cst_13 {dimension_numbers = #tpu.dot_dimension_numbers<[1], [0], [0], [1], [0, 0, 1, 1], [], []>} : vector<128x32xf32>, vector<32x128xf32>, vector<128x128xf32> -> vector<128x128xf32>
    %36 = vector.shape_cast %35 : vector<128x128xf32> to vector<2x8x8x128xf32>
    %37 = vector.shape_cast %13 : vector<2x8x128xf32> to vector<2x1x8x128xf32>
    %38 = vector.broadcast %37 : vector<2x1x8x128xf32> to vector<2x8x8x128xf32>
    %39 = arith.mulf %36, %38 : vector<2x8x8x128xf32>
    %cst_14 = arith.constant dense<0.000000e+00> : vector<2x8x128xf32>
    %40 = vector.multi_reduction <add>, %39, %cst_14 [2] : vector<2x8x8x128xf32> to vector<2x8x128xf32>
    %41 = vector.shape_cast %40 : vector<2x8x128xf32> to vector<16x128xf32>
    %42 = arith.truncf %41 : vector<16x128xf32> to vector<16x128xbf16>
    %c0_15 = arith.constant 0 : index
    %c0_16 = arith.constant 0 : index
    %43 = vector.load %arg4[%c0_15, %c0_16] : memref<128x128xbf16, #tpu.memory_space<vmem>>, vector<128x128xbf16>
    %cst_17 = arith.constant dense<0.000000e+00> : vector<16x128xf32>
    %44 = tpu.matmul %42, %43, %cst_17 {dimension_numbers = #tpu.dot_dimension_numbers<[1], [0], [0], [1], [0, 0, 1, 1], [], []>} : vector<16x128xbf16>, vector<128x128xbf16>, vector<16x128xf32> -> vector<16x128xf32>
    %c0_18 = arith.constant 0 : index
    %c0_19 = arith.constant 0 : index
    %45 = vector.load %arg5[%c0_18, %c0_19] : memref<1x128xf32, #tpu.memory_space<vmem>>, vector<1x128xf32>
    %46 = vector.broadcast %45 : vector<1x128xf32> to vector<16x128xf32>
    %47 = arith.addf %44, %46 : vector<16x128xf32>
    %48 = vector.shape_cast %47 : vector<16x128xf32> to vector<2x8x128xf32>
    %c0_20 = arith.constant 0 : index
    %c0_21 = arith.constant 0 : index
    %c0_22 = arith.constant 0 : index
    %49 = vector.load %arg8[%c0_20, %c0_21, %c0_22] : memref<2x8x128xf32, #tpu.memory_space<vmem>>, vector<2x8x128xf32>
    tpu.vector_store %arg8[%c0_20, %c0_21, %c0_22], %48 {strides = array<i32>} : memref<2x8x128xf32, #tpu.memory_space<vmem>>, vector<2x8x128xf32>,
    return
  }
  func.func @transform_0(%arg0: i32) -> (i32, i32, i32) {
    %c0_i32 = arith.constant 0 : i32
    %c0_i32_0 = arith.constant 0 : i32
    %c0_i32_1 = arith.constant 0 : i32
    return %arg0, %c0_i32, %c0_i32_0 : i32, i32, i32
  }
  func.func @transform_1(%arg0: i32) -> (i32, i32) {
    %c0_i32 = arith.constant 0 : i32
    %c0_i32_0 = arith.constant 0 : i32
    %c0_i32_1 = arith.constant 0 : i32
    return %c0_i32, %c0_i32_0 : i32, i32
  }
  func.func @transform_2(%arg0: i32) -> (i32, i32) {
    %c0_i32 = arith.constant 0 : i32
    %c0_i32_0 = arith.constant 0 : i32
    %c0_i32_1 = arith.constant 0 : i32
    return %c0_i32, %c0_i32_0 : i32, i32
  }
  func.func @transform_3(%arg0: i32) -> (i32, i32) {
    %c0_i32 = arith.constant 0 : i32
    %c0_i32_0 = arith.constant 0 : i32
    %c0_i32_1 = arith.constant 0 : i32
    return %c0_i32, %c0_i32_0 : i32, i32
  }
  func.func @transform_4(%arg0: i32) -> (i32, i32) {
    %c0_i32 = arith.constant 0 : i32
    %c0_i32_0 = arith.constant 0 : i32
    %c0_i32_1 = arith.constant 0 : i32
    return %c0_i32, %c0_i32_0 : i32, i32
  }
  func.func @transform_5(%arg0: i32) -> (i32, i32) {
    %c0_i32 = arith.constant 0 : i32
    %c0_i32_0 = arith.constant 0 : i32
    %c0_i32_1 = arith.constant 0 : i32
    return %c0_i32, %c0_i32_0 : i32, i32
  }
  func.func @transform_6(%arg0: i32) -> (i32, i32) {
    %c0_i32 = arith.constant 0 : i32
    %c0_i32_0 = arith.constant 0 : i32
    %c0_i32_1 = arith.constant 0 : i32
    return %c0_i32, %c0_i32_0 : i32, i32
  }
  func.func @transform_7(%arg0: i32) -> (i32, i32, i32) {
    %c0_i32 = arith.constant 0 : i32
    %c0_i32_0 = arith.constant 0 : i32
    %c0_i32_1 = arith.constant 0 : i32
    return %arg0, %c0_i32, %c0_i32_0 : i32, i32, i32
  }
}

</mosaic_0001>

<bundles_post_ra>
// kernel: fuse_slice_layer.1
= control target key start
LH: loop header
LB: loop body
LE: loop exit
PB: predicated region body
PF: predicated region fallthrough
CT: control target
= control target key end

     0   :  { %12 = vsyncpa [#allocation3], 0  ;;  %s2367_s0 = inlined_call_operand.vmem [shape: f32[2,8,128], index: 0, kind: input, shape index: {}]   ;;  %s2368_s1 = inlined_call_operand.vmem [shape: bf16[128,384], index: 1, kind: input, shape index: {}]   ;;  %s2369_s2 = inlined_call_operand.vmem [shape: f32[1,384], index: 2, kind: input, shape index: {}]   ;;  %s2370_s3 = inlined_call_operand.hbm [shape: bf16[128,128], index: 3, kind: input, shape index: {}]   ;;  %s2371_s4 = inlined_call_operand.vmem [shape: f32[1,128], index: 4, kind: input, shape index: {}]   ;;  %s2372_s5 = inlined_call_operand.vmem [shape: f32[128,32], index: 5, kind: input, shape index: {}]   ;;  %s2373_s6 = inlined_call_operand.hbm [shape: f32[32,128], index: 6, kind: input, shape index: {}]   ;;  %s2374_s7 = inlined_call_operand.vmem [shape: f32[2,8,128], index: 7, kind: output, shape index: {}]  }
   0x1   :  { %13 = vsyncpa [#allocation5], 0  ;;  %s1931_s24 = smov [#allocation2]   ;;  %s1883_s28 = scalar_lea.hbm %s2370_s3, 1024 }
   0x2   :  { %s25_s25 = sshll.u32 %s1931_s24, 4  ;;  %p1884_p0 = scmp.ne.s32.totalorder %s2370_s3, %s1883_s28  ;;  %s26_s25 = int_to_ptr.vmem [resolvable:$true] %s25_s25 }
   0x3   :  { %p1887_p1 = scmp.lt.u32.totalorder %s1883_s28, %s2370_s3 }
   0x5   :  { %p1889_p2 = pnand %p1887_p1, %p1884_p0 }
   0x7   :  { %1892 = shalt.err (!%p1889_p2)
}
   0x8   :  { %s1893_s10 = scalar_lea.vmem %s26_s25, 1024  ;;  %p1898_p4 = scmp.lt.s32.totalorder %s26_s25, %s26_s25 }
   0x9   :  { %p1894_p3 = scmp.ne.s32.totalorder %s26_s25, %s1893_s10  ;;  %p1899_p5 = scmp.lt.s32.totalorder %s1893_s10, %s1893_s10 }
   0xb   :  { %p1900_p6 = por %p1899_p5, %p1898_p4 }
   0xd   :  { %p1901_p7 = pnand %p1900_p6, %p1894_p3 }
   0xf   :  { %1904 = shalt.err (!%p1901_p7)
}
  0x10   :  { %s1932_s11 = smov 64   ;;  %s1933_s12 = smov 4  }
  0x11   :  { %31 = dma.hbm_to_vmem [thread:$0]  %s2370_s3, 1024, %s26_s25, [#allocation3], %s1932_s11, %s1932_s11, %s1933_s12  }
  0x12   :  { %s1934_s15 = smov [#allocation4]   ;;  %s1905_s19 = scalar_lea.hbm %s2373_s6, 512 }
  0x13   :  { %s41_s16 = sshll.u32 %s1934_s15, 4  ;;  %p1906_p8 = scmp.ne.s32.totalorder %s2373_s6, %s1905_s19  ;;  %s42_s16 = int_to_ptr.vmem [resolvable:$true] %s41_s16 }
  0x14   :  { %p1909_p9 = scmp.lt.u32.totalorder %s1905_s19, %s2373_s6 }
  0x16   :  { %p1911_p10 = pnand %p1909_p9, %p1906_p8 }
  0x18   :  { %1914 = shalt.err (!%p1911_p10)
}
  0x19   :  { %s1915_s24 = scalar_lea.vmem %s42_s16, 512  ;;  %p1920_p12 = scmp.lt.s32.totalorder %s42_s16, %s42_s16 }
  0x1a   :  { %p1916_p11 = scmp.ne.s32.totalorder %s42_s16, %s1915_s24  ;;  %p1921_p13 = scmp.lt.s32.totalorder %s1915_s24, %s1915_s24 }
  0x1c   :  { %p1922_p0 = por %p1921_p13, %p1920_p12 }
  0x1e   :  { %p1923_p1 = pnand %p1922_p0, %p1916_p11 }
  0x20   :  { %1926 = shalt.err (!%p1923_p1)
}
  0x21   :  { %s1935_s3 = smov 128   ;;  %s1936_s25 = smov 8  }
  0x22   :  { %47 = dma.hbm_to_vmem [thread:$0]  %s2373_s6, 512, %s42_s16, [#allocation5], %s1935_s3, %s1935_s3, %s1936_s25  }
  0x23   :  { %1927 = dma.done.wait [#allocation3], 1024  }
  0x24   :  { %1928 = vsyncadd [#allocation3], 4294966272 }
  0x25   :  { %1929 = dma.done.wait [#allocation5], 512  }
  0x26   :  { %1930 = vsyncadd [#allocation5], 4294966784  ;;  %v1937_v0 = vmov 0   ;;  %v1778_v1 = vld [vmem:[%s2368_s1 + $0x4] ss:$12 sps:$4 sm:$0xff]   ;;  %v516_v17 = vld [vmem:[%s2372_s5 + $0x8] sm:$0xff]  ;;  %v92_v44 = vlaneseq }
  0x27   :  { %267 = vmatprep.mubr.bf16.mxu0 %v1937_v0  ;;  %v1780_v2 = vld [vmem:[%s2368_s1] ss:$12 sps:$4 sm:$0xff]   ;;  %235 = vmatprep.subr.bf16.mxu0 %v1778_v1  ;;  %v1781_v3 = vld [vmem:[%s2368_s1 + $0x1c] ss:$12 sps:$4 sm:$0xff]   ;;  %v1783_v4 = vld [vmem:[%s2368_s1 + $0x18] ss:$12 sps:$4 sm:$0xff]  }
  0x28   :  { %236 = vmatpush1.bf16.msra.mxu0 %v1780_v2  ;;  %v1784_v5 = vld [vmem:[%s2368_s1 + $0x34] ss:$12 sps:$4 sm:$0xff]   ;;  %v1786_v6 = vld [vmem:[%s2368_s1 + $0x30] ss:$12 sps:$4 sm:$0xff]   ;;  %v1787_v7 = vld [vmem:[%s2368_s1 + $0x4c] ss:$12 sps:$4 sm:$0xff]  }
  0x29   :  { %237 = vmatprep.subr.bf16.mxu0 %v1781_v3  ;;  %v1789_v8 = vld [vmem:[%s2368_s1 + $0x48] ss:$12 sps:$4 sm:$0xff]   ;;  %v1790_v9 = vld [vmem:[%s2368_s1 + $0x64] ss:$12 sps:$4 sm:$0xff]   ;;  %v1792_v10 = vld [vmem:[%s2368_s1 + $0x60] ss:$12 sps:$4 sm:$0xff]  }
  0x2a   :  { %v1793_v11 = vld [vmem:[%s2368_s1 + $0x7c] ss:$12 sps:$4 sm:$0xff]   ;;  %v1795_v12 = vld [vmem:[%s2368_s1 + $0x78] ss:$12 sps:$4 sm:$0xff]   ;;  %v1796_v13 = vld [vmem:[%s2368_s1 + $0x94] ss:$12 sps:$4 sm:$0xff]  }
  0x2b   :  { %v1798_v14 = vld [vmem:[%s2368_s1 + $0x90] ss:$12 sps:$4 sm:$0xff]   ;;  %v1799_v15 = vld [vmem:[%s2368_s1 + $0xac] ss:$12 sps:$4 sm:$0xff]   ;;  %v515_v16 = vld [vmem:[%s2372_s5] sm:$0xff]  ;;  %v2110_v45 = vshrl.u32 %v92_v44, 7 }
  0x2c   :  { %238 = vmatpush1.bf16.msra.mxu0 %v1783_v4  ;;  %v1801_v18 = vld [vmem:[%s2368_s1 + $0xa8] ss:$12 sps:$4 sm:$0xff]   ;;  %v55_v19 = vld [vmem:[%s2367_s0] sm:$0xff]  ;;  %v1728_v21 = vpack.c.bf16 %v516_v17, %v515_v16  ;;  %v518_v23 = vld [vmem:[%s2372_s5 + $0x18] sm:$0xff]  ;;  %v1938_v46 = vmov 1966171168  }
  0x2d   :  { %239 = vmatprep.subr.bf16.mxu0 %v1784_v5  ;;  %v56_v20 = vld [vmem:[%s2367_s0 + $0x8] sm:$0xff]  ;;  %v517_v22 = vld [vmem:[%s2372_s5 + $0x10] sm:$0xff]  ;;  %v519_v26 = vld [vmem:[%s2372_s5 + $0x20] sm:$0xff]  ;;  %v323_v47 = vunpack.c.l.s4 %v1938_v46  ;;  %v2113_v48 = vsub.s32 0, %v2110_v45  ;;  %v98_v52 = vsub.s32 1, %v2110_v45  ;;  %vm1940_vm0 = vmmov 0  }
  0x2e   :  { %v2071_v24 = vpack.c.bf16 %v56_v20, %v55_v19  ;;  %v1732_v25 = vpack.c.bf16 %v518_v23, %v517_v22  ;;  %v520_v27 = vld [vmem:[%s2372_s5 + $0x28] sm:$0xff]  ;;  %v521_v29 = vld [vmem:[%s2372_s5 + $0x30] sm:$0xff]  ;;  %v522_v30 = vld [vmem:[%s2372_s5 + $0x38] sm:$0xff]  ;;  %vm676_vm1 = vcmask 261120   ;;  %vm1361_vm2 = vcmask 1041409  }
  0x2f   :  { %v1736_v28 = vpack.c.bf16 %v520_v27, %v519_v26  ;;  %v1740_v31 = vpack.c.bf16 %v522_v30, %v521_v29  ;;  %v523_v32 = vld [vmem:[%s2372_s5 + $0x40] sm:$0xff]  ;;  %v524_v33 = vld [vmem:[%s2372_s5 + $0x48] sm:$0xff]  ;;  %v525_v35 = vld [vmem:[%s2372_s5 + $0x50] sm:$0xff]  ;;  %v324_v50 = vunpack.c.0.s8 %v323_v47  ;;  %vm1363_vm3 = vcmask 1042434  }
  0x30   :  { %240 = vmatpush1.bf16.msra.mxu0 %v1786_v6  ;;  %v1744_v34 = vpack.c.bf16 %v524_v33, %v523_v32  ;;  %v526_v36 = vld [vmem:[%s2372_s5 + $0x58] sm:$0xff]  ;;  %v527_v38 = vld [vmem:[%s2372_s5 + $0x60] sm:$0xff]  ;;  %v528_v39 = vld [vmem:[%s2372_s5 + $0x68] sm:$0xff]  ;;  %vm1365_vm4 = vcmask 1043459   ;;  %vm1367_vm5 = vcmask 1044484   ;;  %vm1369_vm6 = vcmask 1045509  }
  0x31   :  { %241 = vmatprep.subr.bf16.mxu0 %v1787_v7  ;;  %v1748_v37 = vpack.c.bf16 %v526_v36, %v525_v35  ;;  %v1752_v40 = vpack.c.bf16 %v528_v39, %v527_v38  ;;  %v529_v41 = vld [vmem:[%s2372_s5 + $0x70] sm:$0xff]  ;;  %v530_v42 = vld [vmem:[%s2372_s5 + $0x78] sm:$0xff]  ;;  %v90_v49 = vld [vmem:[%s2369_s2] sm:$0x7]  ;;  %v327_v53 = vsub.s32 %v324_v50, %v2110_v45  ;;  %vm1371_vm7 = vcmask 1046534  }
  0x32   :  { %v1756_v43 = vpack.c.bf16 %v530_v42, %v529_v41  ;;  %v95_v51 = vrot.slane %v90_v49, %v2113_v48  ;;  %v99_v57 = vrot.slane %v90_v49, %v98_v52  ;;  %vm1373_vm8 = vcmask 1047559  }
  0x34   :  { %242 = vmatpush1.bf16.msra.mxu0 %v1789_v8 }
  0x35   :  { %243 = vmatprep.subr.bf16.mxu0 %v1790_v9 }
  0x38   :  { %244 = vmatpush1.bf16.msra.mxu0 %v1792_v10 }
  0x39   :  { %245 = vmatprep.subr.bf16.mxu0 %v1793_v11 }
  0x3c   :  { %246 = vmatpush1.bf16.msra.mxu0 %v1795_v12 }
  0x3d   :  { %247 = vmatprep.subr.bf16.mxu0 %v1796_v13 }
  0x40   :  { %248 = vmatpush1.bf16.msra.mxu0 %v1798_v14 }
  0x41   :  { %249 = vmatprep.subr.bf16.mxu0 %v1799_v15 }
  0x44   :  { %250 = vmatpush1.bf16.msra.mxu0 %v1801_v18 }
  0x45   :  { %1729 = vmatprep.subr.bf16.mxu0 %v1728_v21 }
  0x47   :  { %268 = vmatmul.mubr.bf16.vlgmr.msra.gmra.mrb[0].mxu0 %v2071_v24 }
  0x48   :  { %1731 = vmatpush3.bf16.msra.mxu0 %v1728_v21 }
  0x49   :  { %1733 = vmatprep.subr.bf16.mxu0 %v1732_v25 }
  0x4c   :  { %1735 = vmatpush3.bf16.msra.mxu0 %v1732_v25 }
  0x4d   :  { %1737 = vmatprep.subr.bf16.mxu0 %v1736_v28 }
  0x50   :  { %1739 = vmatpush3.bf16.msra.mxu0 %v1736_v28 }
  0x51   :  { %1741 = vmatprep.subr.bf16.mxu0 %v1740_v31 }
  0x54   :  { %1743 = vmatpush3.bf16.msra.mxu0 %v1740_v31 }
  0x55   :  { %1745 = vmatprep.subr.bf16.mxu0 %v1744_v34 }
  0x58   :  { %1747 = vmatpush3.bf16.msra.mxu0 %v1744_v34 }
  0x59   :  { %1749 = vmatprep.subr.bf16.mxu0 %v1748_v37 }
  0x5c   :  { %1751 = vmatpush3.bf16.msra.mxu0 %v1748_v37 }
  0x5d   :  { %1753 = vmatprep.subr.bf16.mxu0 %v1752_v40 }
  0x60   :  { %1755 = vmatpush3.bf16.msra.mxu0 %v1752_v40 }
  0x61   :  { %1757 = vmatprep.subr.bf16.mxu0 %v1756_v43 }
  0x64   :  { %1759 = vmatpush3.bf16.msra.mxu0 %v1756_v43 }
 0x11a   :  { %v269_v54 = vpop.f32.mrb[0].mxu0 }
 0x11b   :  { %v270_v55 = vadd.f32 %v269_v54, %v95_v51  ;;  %v271_v56 = vpop.f32.mrb[1].mxu0 }
 0x11c   :  { %v273_v58 = vpop.f32.mrb[2].mxu0  ;;  %v272_v3 = vadd.f32 %v271_v56, %v99_v57 }
 0x11d   :  { %v321_v59 = vcombine.high %v270_v55, %v270_v55  ;;  %v328_v60 = vrot.slane %v270_v55, %v327_v53  ;;  %v274_v61 = vadd.f32 %v273_v58, %v95_v51  ;;  %v275_v62 = vpop.f32.mrb[3].mxu0 }
 0x11e   :  { %v276_v5 = vadd.f32 %v275_v62, %v99_v57  ;;  %v1804_v62 = vld [vmem:[%s2368_s1 + $0x38] ss:$12 sps:$4 sm:$0xff]  }
 0x11f   :  { %v335_v63 = vrot.slane %v321_v59, %v327_v53  ;;  %v336_v0 = vcombine.high %v328_v60, %v328_v60  ;;  %v344_v1 = vrot.slane %v328_v60, %v327_v53  ;;  %v370_v2 = vcombine.high %v274_v61, %v274_v61 }
 0x120   :  { %v377_v4 = vrot.slane %v274_v61, %v327_v53  ;;  %v1939_v61 = vmov 0.0  }
 0x121   :  { %v337_v6 = vcombine.high %v335_v63, %v335_v63  ;;  %v351_v7 = vrot.slane %v335_v63, %v327_v53  ;;  %v358_v8 = vrot.slane %v336_v0, %v327_v53  ;;  %v366_v9 = vcombine.high %v344_v1, %v344_v1  ;;  %1600 = vmatprep.subr.bf16.mxu1 %v1939_v61  ;;  %v1805_v63 = vld [vmem:[%s2368_s1 + $0x50] ss:$12 sps:$4 sm:$0xff]   ;;  %v1806_v0 = vld [vmem:[%s2368_s1 + $0x68] ss:$12 sps:$4 sm:$0xff]  }
 0x122   :  { %v384_v10 = vrot.slane %v370_v2, %v327_v53  ;;  %v385_v11 = vcombine.high %v377_v4, %v377_v4  ;;  %v393_v12 = vrot.slane %v377_v4, %v327_v53  ;;  %v422_v13 = vrot.slane %v344_v1, %v2113_v48  ;;  %v1807_v1 = vld [vmem:[%s2368_s1 + $0x80] ss:$12 sps:$4 sm:$0xff]   ;;  %v1808_v2 = vld [vmem:[%s2368_s1 + $0x98] ss:$12 sps:$4 sm:$0xff]   ;;  %1616 = vmatprep.mubr.msk.bf16.mxu1 %vm1940_vm0, %v1939_v61 }
 0x123   :  { %v426_v14 = vrot.slane %v358_v8, %v2113_v48  ;;  %v430_v15 = vrot.slane %v366_v9, %v2113_v48  ;;  %v368_v16 = vcombine.high %v358_v8, %v358_v8  ;;  %v438_v17 = vrot.slane %v351_v7, %v2113_v48  ;;  %v981_v4 = vld [vmem:[#allocation4] sm:$0xff]  ;;  %v984_v8 = vld [vmem:[#allocation4 + $0x18] sm:$0xff] }
 0x124   :  { %v386_v18 = vcombine.high %v384_v10, %v384_v10  ;;  %v400_v19 = vrot.slane %v384_v10, %v327_v53  ;;  %v407_v20 = vrot.slane %v385_v11, %v327_v53  ;;  %v415_v21 = vcombine.high %v393_v12, %v393_v12 }
 0x125   :  { %v499_v22 = vmul.f32 %v422_v13, %v272_v3  ;;  %v500_v23 = vmul.f32 %v426_v14, %v272_v3  ;;  %v501_v25 = vmul.f32 %v430_v15, %v272_v3  ;;  %v434_v26 = vrot.slane %v368_v16, %v2113_v48 }
 0x126   :  { %v503_v27 = vmul.f32 %v438_v17, %v272_v3  ;;  %v365_v28 = vrot.slane %v337_v6, %v327_v53  ;;  %v367_v29 = vcombine.high %v351_v7, %v351_v7  ;;  %v454_v30 = vrot.slane %v393_v12, %v2113_v48  ;;  %v983_v7 = vld [vmem:[#allocation4 + $0x10] sm:$0xff] }
 0x127   :  { %1652 = vmatprep.mubr.f32.mxu0 %v499_v22  ;;  %v502_v31 = vmul.f32 %v434_v26, %v272_v3  ;;  %v458_v32 = vrot.slane %v407_v20, %v2113_v48  ;;  %v462_v33 = vrot.slane %v415_v21, %v2113_v48  ;;  %v417_v34 = vcombine.high %v407_v20, %v407_v20 }
 0x128   :  { %1653 = vmatmul.mubr.f32.vlgmr.msra.gmra.mrb[4].mxu0 %v500_v23  ;;  %v442_v35 = vrot.slane %v365_v28, %v2113_v48  ;;  %v446_v36 = vrot.slane %v367_v29, %v2113_v48  ;;  %v369_v37 = vcombine.high %v365_v28, %v365_v28  ;;  %v507_v38 = vmul.f32 %v454_v30, %v276_v5 }
 0x129   :  { %1655 = vmatprep.mubr.f32.mxu0 %v501_v25  ;;  %v508_v39 = vmul.f32 %v458_v32, %v276_v5  ;;  %v509_v40 = vmul.f32 %v462_v33, %v276_v5  ;;  %v466_v41 = vrot.slane %v417_v34, %v2113_v48  ;;  %v470_v42 = vrot.slane %v400_v19, %v2113_v48 }
 0x12a   :  { %v504_v43 = vmul.f32 %v442_v35, %v272_v3  ;;  %v505_v44 = vmul.f32 %v446_v36, %v272_v3  ;;  %v450_v46 = vrot.slane %v369_v37, %v2113_v48  ;;  %v414_v47 = vrot.slane %v386_v18, %v327_v53  ;;  %v1802_v53 = vld [vmem:[%s2368_s1 + $0x8] ss:$12 sps:$4 sm:$0xff]  }
 0x12b   :  { %v510_v49 = vmul.f32 %v466_v41, %v276_v5  ;;  %v511_v50 = vmul.f32 %v470_v42, %v276_v5  ;;  %v416_v51 = vcombine.high %v400_v19, %v400_v19  ;;  %1601 = vmatpush3.bf16.msra.mxu1 %v1802_v53  ;;  %v1764_v9 = vpack.c.bf16 %v984_v8, %v983_v7 }
 0x12c   :  { %1656 = vmatmul.mubr.f32.gmra.mrb[6].mxu0 %v502_v31  ;;  %v506_v52 = vmul.f32 %v450_v46, %v272_v3  ;;  %v474_v54 = vrot.slane %v414_v47, %v2113_v48  ;;  %v418_v55 = vcombine.high %v414_v47, %v414_v47  ;;  %1602 = vmatprep.subr.bf16.mxu1 %v1939_v61  ;;  %v1809_v3 = vld [vmem:[%s2368_s1 + $0xb0] ss:$12 sps:$4 sm:$0xff]  }
 0x12d   :  { %1658 = vmatprep.mubr.f32.mxu0 %v503_v27  ;;  %v478_v56 = vrot.slane %v416_v51, %v2113_v48 }
 0x12e   :  { %v512_v57 = vmul.f32 %v474_v54, %v276_v5  ;;  %v482_v58 = vrot.slane %v418_v55, %v2113_v48  ;;  %v1803_v48 = vld [vmem:[%s2368_s1 + $0x20] ss:$12 sps:$4 sm:$0xff]  }
 0x12f   :  { %v513_v59 = vmul.f32 %v478_v56, %v276_v5  ;;  %1603 = vmatpush3.bf16.msra.mxu1 %v1803_v48 }
 0x130   :  { %1659 = vmatmul.mubr.f32.gmra.mrb[8].mxu0 %v504_v43  ;;  %v514_v60 = vmul.f32 %v482_v58, %v276_v5  ;;  %1604 = vmatprep.subr.bf16.mxu1 %v1939_v61  ;;  %v982_v5 = vld [vmem:[#allocation4 + $0x8] sm:$0xff] }
 0x131   :  { %1661 = vmatprep.mubr.f32.mxu0 %v505_v44  ;;  %v1760_v6 = vpack.c.bf16 %v982_v5, %v981_v4 }
 0x133   :  { %1605 = vmatpush3.bf16.msra.mxu1 %v1804_v62 }
 0x134   :  { %1662 = vmatmul.mubr.f32.gmra.mrb[10].mxu0 %v506_v52  ;;  %1606 = vmatprep.subr.bf16.mxu1 %v1939_v61 }
 0x135   :  { %1664 = vmatprep.mubr.f32.mxu0 %v507_v38 }
 0x137   :  { %1607 = vmatpush3.bf16.msra.mxu1 %v1805_v63 }
 0x138   :  { %1665 = vmatmul.mubr.f32.gmra.mrb[12].mxu0 %v508_v39  ;;  %1608 = vmatprep.subr.bf16.mxu1 %v1939_v61 }
 0x139   :  { %1667 = vmatprep.mubr.f32.mxu0 %v509_v40 }
 0x13b   :  { %1609 = vmatpush3.bf16.msra.mxu1 %v1806_v0 }
 0x13c   :  { %1668 = vmatmul.mubr.f32.gmra.mrb[14].mxu0 %v510_v49  ;;  %1610 = vmatprep.subr.bf16.mxu1 %v1939_v61 }
 0x13d   :  { %1670 = vmatprep.mubr.f32.mxu0 %v511_v50 }
 0x13f   :  { %1611 = vmatpush3.bf16.msra.mxu1 %v1807_v1 }
 0x140   :  { %1671 = vmatmul.mubr.f32.gmra.mrb[16].mxu0 %v512_v57  ;;  %1612 = vmatprep.subr.bf16.mxu1 %v1939_v61 }
 0x141   :  { %1673 = vmatprep.mubr.f32.mxu0 %v513_v59 }
 0x143   :  { %1613 = vmatpush3.bf16.msra.mxu1 %v1808_v2 }
 0x144   :  { %1674 = vmatmul.mubr.f32.gmra.mrb[18].mxu0 %v514_v60  ;;  %1614 = vmatprep.subr.bf16.mxu1 %v1939_v61 }
 0x147   :  { %1615 = vmatpush3.bf16.msra.mxu1 %v1809_v3 }
 0x148   :  { %1761 = vmatprep.subr.bf16.mxu1 %v1760_v6 }
 0x14a   :  { %1617 = vmatmul.mubr.bf16.vlgmr.msra.gmra.mrb[0].mxu1 %v2071_v24 }
 0x14b   :  { %1763 = vmatpush3.bf16.msra.mxu1 %v1760_v6 }
 0x14c   :  { %1765 = vmatprep.subr.bf16.mxu1 %v1764_v9 }
 0x14f   :  { %1767 = vmatpush3.bf16.msra.mxu1 %v1764_v9 }
 0x150   :  { %1708 = vmatprep.subr.bf16.mxu1 %v1939_v61 }
 0x1fb   :  { %v1654_v10 = vpop.f32.mrb[4].mxu0 }
 0x1fc   :  { %v684_v11 = vsel %vm676_vm1, %v1654_v10, -inf  ;;  %v597_v12 = vpop.f32.mrb[5].mxu0 }
 0x1fd   :  { %v685_v13 = vrot.slane %v684_v11, 4  ;;  %v677_v24 = vsel %vm676_vm1, %v597_v12, -inf }
 0x1fe   :  { %v678_v14 = vrot.slane %v677_v24, 4 }
 0x1ff   :  { %v686_v15 = vmax.f32 %v684_v11, %v685_v13  ;;  %v1657_v16 = vpop.f32.mrb[6].mxu0 }
 0x200   :  { %v679_v17 = vmax.f32 %v677_v24, %v678_v14  ;;  %v698_v18 = vsel %vm676_vm1, %v1657_v16, -inf  ;;  %v607_v19 = vpop.f32.mrb[7].mxu0 }
 0x201   :  { %v687_v20 = vrot.slane %v686_v15, 2  ;;  %v699_v21 = vrot.slane %v698_v18, 4  ;;  %v691_v22 = vsel %vm676_vm1, %v607_v19, -inf }
 0x202   :  { %v680_v23 = vrot.slane %v679_v17, 2  ;;  %v692_v25 = vrot.slane %v691_v22, 4 }
 0x203   :  { %v688_v26 = vmax.f32 %v686_v15, %v687_v20  ;;  %v700_v27 = vmax.f32 %v698_v18, %v699_v21  ;;  %v2177_v28 = vpop.f32.mrb[8].mxu0 }
 0x204   :  { %v681_v29 = vmax.f32 %v679_v17, %v680_v23  ;;  %v693_v30 = vmax.f32 %v691_v22, %v692_v25  ;;  %v712_v31 = vsel %vm676_vm1, %v2177_v28, -inf  ;;  %v2181_v32 = vpop.f32.mrb[9].mxu0 }
 0x205   :  { %v689_v33 = vrot.slane %v688_v26, 1  ;;  %v701_v34 = vrot.slane %v700_v27, 2  ;;  %v713_v35 = vrot.slane %v712_v31, 4  ;;  %v705_v36 = vsel %vm676_vm1, %v2181_v32, -inf }
 0x206   :  { %v682_v37 = vrot.slane %v681_v29, 1  ;;  %v694_v38 = vrot.slane %v693_v30, 2  ;;  %v706_v39 = vrot.slane %v705_v36, 4 }
 0x207   :  { %v690_v40 = vmax.f32 %v688_v26, %v689_v33  ;;  %v702_v41 = vmax.f32 %v700_v27, %v701_v34  ;;  %v714_v42 = vmax.f32 %v712_v31, %v713_v35  ;;  %v2185_v43 = vpop.f32.mrb[10].mxu0 }
 0x208   :  { %v683_v44 = vmax.f32 %v681_v29, %v682_v37  ;;  %v695_v46 = vmax.f32 %v693_v30, %v694_v38  ;;  %v707_v47 = vmax.f32 %v705_v36, %v706_v39  ;;  %v726_v49 = vsel %vm676_vm1, %v2185_v43, -inf  ;;  %v2189_v50 = vpop.f32.mrb[11].mxu0 }
 0x209   :  { %v790_v51 = vsub.f32 %v1654_v10, %v690_v40  ;;  %v703_v52 = vrot.slane %v702_v41, 1  ;;  %v715_v54 = vrot.slane %v714_v42, 2  ;;  %v727_v55 = vrot.slane %v726_v49, 4 }
 0x20a   :  { %v789_v56 = vsub.f32 %v597_v12, %v683_v44  ;;  %v696_v57 = vrot.slane %v695_v46, 1  ;;  %v708_v58 = vrot.slane %v707_v47, 2  ;;  %v719_v59 = vsel %vm676_vm1, %v2189_v50, -inf }
 0x20b   :  { %v807_v60 = vmul.f32 1.442695, %v790_v51  ;;  %v704_v53 = vmax.f32 %v702_v41, %v703_v52  ;;  %v716_v48 = vmax.f32 %v714_v42, %v715_v54  ;;  %v728_v62 = vmax.f32 %v726_v49, %v727_v55  ;;  %v2193_v63 = vpop.f32.mrb[12].mxu0 }
 0x20c   :  { %v805_v0 = vmul.f32 1.442695, %v789_v56  ;;  %v697_v1 = vmax.f32 %v695_v46, %v696_v57  ;;  %v709_v2 = vmax.f32 %v707_v47, %v708_v58  ;;  %v720_v3 = vrot.slane %v719_v59, 4  ;;  %v2195_v4 = vpop.f32.mrb[13].mxu0 }
 0x20d   :  { %1818 = vpow2.f32 %v807_v60  ;;  %v792_v5 = vsub.f32 %v1657_v16, %v704_v53  ;;  %v717_v6 = vrot.slane %v716_v48, 1  ;;  %v729_v7 = vrot.slane %v728_v62, 2 }
 0x20e   :  { %1820 = vpow2.f32 %v805_v0  ;;  %v791_v8 = vsub.f32 %v607_v19, %v697_v1  ;;  %v710_v9 = vrot.slane %v709_v2, 1  ;;  %v721_v10 = vmax.f32 %v719_v59, %v720_v3 }
 0x20f   :  { %v811_v11 = vmul.f32 1.442695, %v792_v5  ;;  %v718_v12 = vmax.f32 %v716_v48, %v717_v6  ;;  %v730_v13 = vmax.f32 %v728_v62, %v729_v7  ;;  %v740_v24 = vsel %vm676_vm1, %v2193_v63, -inf  ;;  %v2199_v14 = vpop.f32.mrb[14].mxu0 }
 0x210   :  { %v809_v15 = vmul.f32 1.442695, %v791_v8  ;;  %v711_v17 = vmax.f32 %v709_v2, %v710_v9  ;;  %v722_v18 = vrot.slane %v721_v10, 2  ;;  %v741_v20 = vrot.slane %v740_v24, 4  ;;  %v2201_v21 = vpop.f32.mrb[15].mxu0 }
 0x211   :  { %1822 = vpow2.f32 %v811_v11  ;;  %v794_v16 = vsub.f32 %v2177_v28, %v718_v12  ;;  %v731_v19 = vrot.slane %v730_v13, 1  ;;  %v733_v22 = vsel %vm676_vm1, %v2195_v4, -inf }
 0x212   :  { %1824 = vpow2.f32 %v809_v15  ;;  %v793_v23 = vsub.f32 %v2181_v32, %v711_v17  ;;  %v723_v25 = vmax.f32 %v721_v10, %v722_v18  ;;  %v742_v26 = vmax.f32 %v740_v24, %v741_v20 }
 0x213   :  { %v815_v27 = vmul.f32 1.442695, %v794_v16  ;;  %v732_v29 = vmax.f32 %v730_v13, %v731_v19  ;;  %v734_v30 = vrot.slane %v733_v22, 4  ;;  %v754_v31 = vsel %vm676_vm1, %v2199_v14, -inf  ;;  %v2209_v33 = vpop.f32.mrb[16].mxu0 }
 0x214   :  { %v813_v34 = vmul.f32 1.442695, %v793_v23  ;;  %v724_v35 = vrot.slane %v723_v25, 1  ;;  %v743_v28 = vrot.slane %v742_v26, 2  ;;  %v755_v36 = vrot.slane %v754_v31, 4  ;;  %v2211_v37 = vpop.f32.mrb[17].mxu0 }
 0x215   :  { %1826 = vpow2.f32 %v815_v27  ;;  %v796_v38 = vsub.f32 %v2185_v43, %v732_v29  ;;  %v735_v32 = vmax.f32 %v733_v22, %v734_v30  ;;  %v747_v47 = vsel %vm676_vm1, %v2201_v21, -inf }
 0x216   :  { %1828 = vpow2.f32 %v813_v34  ;;  %v725_v39 = vmax.f32 %v723_v25, %v724_v35  ;;  %v744_v40 = vmax.f32 %v742_v26, %v743_v28  ;;  %v756_v41 = vmax.f32 %v754_v31, %v755_v36 }
 0x217   :  { %v2214_v42 = vpop.eup %1818  ;;  %v819_v44 = vmul.f32 1.442695, %v796_v38  ;;  %v736_v46 = vrot.slane %v735_v32, 2  ;;  %v2218_v49 = vpop.f32.mrb[18].mxu0  ;;  %v748_v3 = vrot.slane %v747_v47, 4  ;;  %v768_v15 = vsel %vm676_vm1, %v2209_v33, -inf }
 0x218   :  { %v2220_v51 = vpop.eup %1820  ;;  %v844_v52 = vsel %vm676_vm1, %v2214_v42, 0.0  ;;  %v795_v43 = vsub.f32 %v2189_v50, %v725_v39  ;;  %v745_v54 = vrot.slane %v744_v40, 1  ;;  %v757_v55 = vrot.slane %v756_v41, 2  ;;  %v2225_v56 = vpop.f32.mrb[19].mxu0 }
 0x219   :  { %v845_v57 = vrot.slane %v844_v52, 4  ;;  %v837_v58 = vsel %vm676_vm1, %v2220_v51, 0.0  ;;  %1830 = vpow2.f32 %v819_v44  ;;  %v737_v59 = vmax.f32 %v735_v32, %v736_v46 }
 0x21a   :  { %v838_v60 = vrot.slane %v837_v58, 4  ;;  %v817_v53 = vmul.f32 1.442695, %v795_v43  ;;  %v746_v48 = vmax.f32 %v744_v40, %v745_v54  ;;  %v758_v2 = vmax.f32 %v756_v41, %v757_v55 }
 0x21b   :  { %v2229_v62 = vpop.eup %1822  ;;  %v846_v0 = vadd.f32 %v845_v57, %v844_v52  ;;  %v738_v1 = vrot.slane %v737_v59, 1  ;;  %v749_v25 = vmax.f32 %v747_v47, %v748_v3  ;;  %v769_v32 = vrot.slane %v768_v15, 4 }
 0x21c   :  { %v2231_v50 = vpop.eup %1824  ;;  %v839_v5 = vadd.f32 %v838_v60, %v837_v58  ;;  %v858_v6 = vsel %vm676_vm1, %v2229_v62, 0.0  ;;  %1832 = vpow2.f32 %v817_v53  ;;  %v798_v7 = vsub.f32 %v2193_v63, %v746_v48 }
 0x21d   :  { %v847_v8 = vrot.slane %v846_v0, 2  ;;  %v859_v9 = vrot.slane %v858_v6, 4  ;;  %v851_v10 = vsel %vm676_vm1, %v2231_v50, 0.0  ;;  %v739_v11 = vmax.f32 %v737_v59, %v738_v1 }
 0x21e   :  { %v840_v12 = vrot.slane %v839_v5, 2  ;;  %v852_v13 = vrot.slane %v851_v10, 4  ;;  %v823_v24 = vmul.f32 1.442695, %v798_v7  ;;  %v759_v19 = vrot.slane %v758_v2, 1 }
 0x21f   :  { %v2240_v17 = vpop.eup %1826  ;;  %v848_v18 = vadd.f32 %v847_v8, %v846_v0  ;;  %v860_v20 = vadd.f32 %v859_v9, %v858_v6  ;;  %v797_v16 = vsub.f32 %v2195_v4, %v739_v11  ;;  %v750_v44 = vrot.slane %v749_v25, 2 }
 0x220   :  { %v2243_v63 = vpop.eup %1828  ;;  %v853_v22 = vadd.f32 %v852_v13, %v851_v10  ;;  %v872_v23 = vsel %vm676_vm1, %v2240_v17, 0.0  ;;  %1834 = vpow2.f32 %v823_v24  ;;  %v841_v26 = vadd.f32 %v840_v12, %v839_v5 }
 0x221   :  { %v861_v27 = vrot.slane %v860_v20, 2  ;;  %v873_v29 = vrot.slane %v872_v23, 4  ;;  %v865_v30 = vsel %vm676_vm1, %v2243_v63, 0.0  ;;  %v821_v35 = vmul.f32 1.442695, %v797_v16 }
 0x222   :  { %v854_v31 = vrot.slane %v853_v22, 2  ;;  %v866_v34 = vrot.slane %v865_v30, 4  ;;  %v849_v4 = vrot.slane %v848_v18, 1  ;;  %v760_v38 = vmax.f32 %v758_v2, %v759_v19 }
 0x223   :  { %v2249_v28 = vpop.eup %1830  ;;  %v874_v36 = vadd.f32 %v873_v29, %v872_v23  ;;  %v862_v39 = vadd.f32 %v861_v27, %v860_v20  ;;  %v842_v46 = vrot.slane %v841_v26, 1  ;;  %1836 = vpow2.f32 %v821_v35 }
 0x224   :  { %v867_v40 = vadd.f32 %v866_v34, %v865_v30  ;;  %v886_v41 = vsel %vm676_vm1, %v2249_v28, 0.0  ;;  %v855_v47 = vadd.f32 %v854_v31, %v853_v22  ;;  %v800_v57 = vsub.f32 %v2199_v14, %v760_v38 }
 0x225   :  { %v875_v52 = vrot.slane %v874_v36, 2  ;;  %v887_v43 = vrot.slane %v886_v41, 4  ;;  %v850_v58 = vadd.f32 %v849_v4, %v848_v18  ;;  %v863_v53 = vrot.slane %v862_v39, 1 }
 0x226   :  { %v2253_v54 = vpop.eup %1832  ;;  %v868_v55 = vrot.slane %v867_v40, 2  ;;  %v827_v1 = vmul.f32 1.442695, %v800_v57  ;;  %v843_v2 = vadd.f32 %v842_v46, %v841_v26  ;;  %v856_v3 = vrot.slane %v855_v47, 1 }
 0x227   :  { %v876_v59 = vadd.f32 %v875_v52, %v874_v36  ;;  %v879_v60 = vsel %vm676_vm1, %v2253_v54, 0.0  ;;  %v888_v48 = vadd.f32 %v887_v43, %v886_v41  ;;  %v751_v5 = vmax.f32 %v749_v25, %v750_v44 }
 0x228   :  { %v880_v0 = vrot.slane %v879_v60, 4  ;;  %v770_v6 = vmax.f32 %v768_v15, %v769_v32  ;;  %v869_v8 = vadd.f32 %v868_v55, %v867_v40  ;;  %1838 = vpow2.f32 %v827_v1 }
 0x229   :  { %v761_v14 = vsel %vm676_vm1, %v2211_v37, -inf  ;;  %1840 = vrcp.f32 %v850_v58  ;;  %v877_v10 = vrot.slane %v876_v59, 1  ;;  %v752_v12 = vrot.slane %v751_v5, 1 }
 0x22a   :  { %v2258_v7 = vpop.eup %1834  ;;  %v881_v9 = vadd.f32 %v880_v0, %v879_v60  ;;  %v864_v13 = vadd.f32 %v863_v53, %v862_v39  ;;  %v889_v24 = vrot.slane %v888_v48, 2  ;;  %v771_v20 = vrot.slane %v770_v6, 2 }
 0x22b   :  { %v900_v11 = vsel %vm676_vm1, %v2258_v7, 0.0  ;;  %v857_v16 = vadd.f32 %v856_v3, %v855_v47  ;;  %v753_v15 = vmax.f32 %v751_v5, %v752_v12  ;;  %v762_v19 = vrot.slane %v761_v14, 4 }
 0x22c   :  { %v901_v18 = vrot.slane %v900_v11, 4  ;;  %v782_v22 = vsel %vm676_vm1, %v2218_v49, -inf  ;;  %v870_v23 = vrot.slane %v869_v8, 1  ;;  %v882_v25 = vrot.slane %v881_v9, 2 }
 0x22d   :  { %v772_v26 = vmax.f32 %v770_v6, %v771_v20  ;;  %v783_v27 = vrot.slane %v782_v22, 4  ;;  %v878_v29 = vadd.f32 %v877_v10, %v876_v59  ;;  %v799_v30 = vsub.f32 %v2201_v21, %v753_v15  ;;  %v2269_v35 = vpop.eup %1836 }
 0x22e   :  { %v763_v31 = vmax.f32 %v761_v14, %v762_v19  ;;  %v775_v34 = vsel %vm676_vm1, %v2225_v56, -inf  ;;  %v890_v4 = vadd.f32 %v889_v24, %v888_v48  ;;  %v902_v36 = vadd.f32 %v901_v18, %v900_v11 }
 0x22f   :  { %v773_v38 = vrot.slane %v772_v26, 1  ;;  %v784_v32 = vmax.f32 %v782_v22, %v783_v27  ;;  %v893_v39 = vsel %vm676_vm1, %v2269_v35, 0.0  ;;  %v825_v40 = vmul.f32 1.442695, %v799_v30 }
 0x230   :  { %v764_v41 = vrot.slane %v763_v31, 2  ;;  %v776_v44 = vrot.slane %v775_v34, 4  ;;  %v871_v46 = vadd.f32 %v870_v23, %v869_v8  ;;  %v883_v47 = vadd.f32 %v882_v25, %v881_v9 }
 0x231   :  { %v894_v52 = vrot.slane %v893_v39, 4  ;;  %v774_v21 = vmax.f32 %v772_v26, %v773_v38  ;;  %1842 = vpow2.f32 %v825_v40  ;;  %v785_v55 = vrot.slane %v784_v32, 2 }
 0x232   :  { %v765_v43 = vmax.f32 %v763_v31, %v764_v41  ;;  %v777_v57 = vmax.f32 %v775_v34, %v776_v44  ;;  %v2273_v58 = vpop.eup %1838  ;;  %v903_v59 = vrot.slane %v902_v36, 2  ;;  %1844 = vrcp.f32 %v843_v2 }
 0x233   :  { %v895_v60 = vadd.f32 %v894_v52, %v893_v39  ;;  %v802_v53 = vsub.f32 %v2209_v33, %v774_v21  ;;  %v1841_v48 = vpop.eup %1840  ;;  %v914_v0 = vsel %vm676_vm1, %v2273_v58, 0.0  ;;  %v786_v3 = vmax.f32 %v784_v32, %v785_v55 }
 0x234   :  { %v766_v1 = vrot.slane %v765_v43, 1  ;;  %v778_v5 = vrot.slane %v777_v57, 2  ;;  %v884_v6 = vrot.slane %v883_v47, 1  ;;  %v915_v9 = vrot.slane %v914_v0, 4 }
 0x235   :  { %v896_v8 = vrot.slane %v895_v60, 2  ;;  %v831_v14 = vmul.f32 1.442695, %v802_v53  ;;  %v891_v10 = vrot.slane %v890_v4, 1  ;;  %v787_v12 = vrot.slane %v786_v3, 1 }
 0x236   :  { %v767_v11 = vmax.f32 %v765_v43, %v766_v1  ;;  %v779_v24 = vmax.f32 %v777_v57, %v778_v5  ;;  %v904_v18 = vadd.f32 %v903_v59, %v902_v36  ;;  %v916_v15 = vadd.f32 %v915_v9, %v914_v0 }
 0x237   :  { %v897_v20 = vadd.f32 %v896_v8, %v895_v60  ;;  %1846 = vpow2.f32 %v831_v14  ;;  %v788_v2 = vmax.f32 %v786_v3, %v787_v12  ;;  %v885_v22 = vadd.f32 %v884_v6, %v883_v47 }
 0x238   :  { %v801_v33 = vsub.f32 %v2211_v37, %v767_v11  ;;  %v780_v19 = vrot.slane %v779_v24, 1  ;;  %1848 = vrcp.f32 %v857_v16  ;;  %v917_v25 = vrot.slane %v916_v15, 2 }
 0x239   :  { %v898_v23 = vrot.slane %v897_v20, 1  ;;  %1850 = vrcp.f32 %v864_v13  ;;  %v804_v27 = vsub.f32 %v2218_v49, %v788_v2  ;;  %v892_v31 = vadd.f32 %v891_v10, %v890_v4 }
 0x23a   :  { %v829_v26 = vmul.f32 1.442695, %v801_v33  ;;  %v781_v30 = vmax.f32 %v779_v24, %v780_v19  ;;  %1852 = vrcp.f32 %v871_v46  ;;  %v905_v34 = vrot.slane %v904_v18, 1 }
 0x23b   :  { %1854 = vrcp.f32 %v878_v29  ;;  %v2280_v36 = vpop.eup %1842  ;;  %v835_v38 = vmul.f32 1.442695, %v804_v27  ;;  %v899_v16 = vadd.f32 %v898_v23, %v897_v20  ;;  %v918_v39 = vadd.f32 %v917_v25, %v916_v15 }
 0x23c   :  { %1856 = vpow2.f32 %v829_v26  ;;  %v803_v37 = vsub.f32 %v2225_v56, %v781_v30  ;;  %v1845_v32 = vpop.eup %1844  ;;  %v907_v13 = vsel %vm676_vm1, %v2280_v36, 0.0  ;;  %v906_v41 = vadd.f32 %v905_v34, %v904_v18 }
 0x23d   :  { %1858 = vrcp.f32 %v885_v22  ;;  %v908_v40 = vrot.slane %v907_v13, 4  ;;  %v965_v4 = vmul.f32 %v1845_v32, %v2220_v51  ;;  %v966_v29 = vmul.f32 %v1841_v48, %v2214_v42 }
 0x23e   :  { %1860 = vpow2.f32 %v835_v38  ;;  %v833_v49 = vmul.f32 1.442695, %v803_v37  ;;  %v919_v46 = vrot.slane %v918_v39, 1 }
 0x23f   :  { %1862 = vrcp.f32 %v892_v31  ;;  %v909_v44 = vadd.f32 %v908_v40, %v907_v13  ;;  %1684 = vmatprep.mubr.msk.f32.mxu1 %vm676_vm1, %v965_v4 }
 0x240   :  { %1864 = vpow2.f32 %v833_v49  ;;  %1685 = vmatmul.mubr.msk.f32.vlgmr.msra.gmra.mrb[4].mxu1 %vm676_vm1, %v966_v29  ;;  %v920_v53 = vadd.f32 %v919_v46, %v918_v39 }
 0x241   :  { %v2288_v56 = vpop.eup %1846  ;;  %1866 = vrcp.f32 %v899_v16  ;;  %v910_v52 = vrot.slane %v909_v44, 2 }
 0x242   :  { %v1849_v47 = vpop.eup %1848  ;;  %v928_v21 = vsel %vm676_vm1, %v2288_v56, 0.0  ;;  %1868 = vrcp.f32 %v906_v41 }
 0x243   :  { %v1851_v51 = vpop.eup %1850  ;;  %v929_v43 = vrot.slane %v928_v21, 4  ;;  %v967_v42 = vmul.f32 %v1849_v47, %v2231_v50  ;;  %v911_v57 = vadd.f32 %v910_v52, %v909_v44  ;;  %1870 = vrcp.f32 %v920_v53  ;;  %v1814_v53 = vld [vmem:[#allocation2 + $0x20] sm:$0xff]  }
 0x244   :  { %v1853_v55 = vpop.eup %1852  ;;  %v968_v59 = vmul.f32 %v1851_v51, %v2229_v62 }
 0x245   :  { %v1855_v60 = vpop.eup %1854  ;;  %v930_v48 = vadd.f32 %v929_v43, %v928_v21  ;;  %1687 = vmatprep.mubr.msk.f32.mxu1 %vm676_vm1, %v967_v42  ;;  %v969_v0 = vmul.f32 %v1853_v55, %v2243_v63  ;;  %v912_v3 = vrot.slane %v911_v57, 1 }
 0x246   :  { %v1857_v1 = vpop.eup %1856  ;;  %1688 = vmatmul.mubr.msk.f32.gmra.mrb[6].mxu1 %vm676_vm1, %v968_v59  ;;  %v970_v14 = vmul.f32 %v1855_v60, %v2240_v17  ;;  %v1812_v59 = vld [vmem:[#allocation2 + $0x10] sm:$0xff]   ;;  %v1813_v60 = vld [vmem:[#allocation2 + $0x18] sm:$0xff]  }
 0x247   :  { %v1859_v5 = vpop.eup %1858  ;;  %v931_v6 = vrot.slane %v930_v48, 2  ;;  %v921_v50 = vsel %vm676_vm1, %v1857_v1, 0.0  ;;  %1690 = vmatprep.mubr.msk.f32.mxu1 %vm676_vm1, %v969_v0  ;;  %v913_v9 = vadd.f32 %v912_v3, %v911_v57  ;;  %v1811_v57 = vld [vmem:[#allocation2 + $0x8] sm:$0xff]   ;;  %v1816_v0 = vld [vmem:[#allocation2 + $0x30] sm:$0xff]   ;;  %v102_v3 = vsub.s32 2, %v2110_v45 }
 0x248   :  { %v1861_v8 = vpop.eup %1860  ;;  %v922_v62 = vrot.slane %v921_v50, 4  ;;  %v971_v10 = vmul.f32 %v1859_v5, %v2253_v54  ;;  %v1882_v5 = vld [vmem:[%s2369_s2] sm:$0x7] }
 0x249   :  { %v1863_v11 = vpop.eup %1862  ;;  %v932_v12 = vadd.f32 %v931_v6, %v930_v48  ;;  %v942_v63 = vsel %vm676_vm1, %v1861_v8, 0.0  ;;  %1872 = vrcp.f32 %v913_v9  ;;  %v1815_v48 = vld [vmem:[#allocation2 + $0x28] sm:$0xff]   ;;  %v103_v6 = vrot.slane %v1882_v5, %v102_v3 }
 0x24a   :  { %v1865_v24 = vpop.eup %1864  ;;  %v923_v18 = vadd.f32 %v922_v62, %v921_v50  ;;  %v943_v20 = vrot.slane %v942_v63, 4  ;;  %1691 = vmatmul.mubr.msk.f32.gmra.mrb[8].mxu1 %vm676_vm1, %v970_v14  ;;  %v972_v17 = vmul.f32 %v1863_v11, %v2249_v28 }
 0x24b   :  { %v1867_v15 = vpop.eup %1866  ;;  %v933_v33 = vrot.slane %v932_v12, 1  ;;  %v935_v2 = vsel %vm676_vm1, %v1865_v24, 0.0  ;;  %1693 = vmatprep.mubr.msk.f32.mxu1 %vm676_vm1, %v971_v10 }
 0x24c   :  { %v924_v54 = vrot.slane %v923_v18, 2  ;;  %v944_v19 = vadd.f32 %v943_v20, %v942_v63  ;;  %v936_v22 = vrot.slane %v935_v2, 4  ;;  %v973_v23 = vmul.f32 %v1867_v15, %v2269_v35  ;;  %v1869_v25 = vpop.eup %1868 }
 0x24d   :  { %v934_v31 = vadd.f32 %v933_v33, %v932_v12  ;;  %v974_v32 = vmul.f32 %v1869_v25, %v2258_v7  ;;  %v1871_v35 = vpop.eup %1870 }
 0x24e   :  { %v925_v26 = vadd.f32 %v924_v54, %v923_v18  ;;  %v945_v27 = vrot.slane %v944_v19, 2  ;;  %v937_v30 = vadd.f32 %v936_v22, %v935_v2  ;;  %1694 = vmatmul.mubr.msk.f32.gmra.mrb[10].mxu1 %vm676_vm1, %v972_v17  ;;  %v976_v29 = vmul.f32 %v1871_v35, %v2273_v58  ;;  %v312_v58 = vpop.f32.mrb[0].mxu1 }
 0x24f   :  { %1696 = vmatprep.mubr.msk.f32.mxu1 %vm676_vm1, %v973_v23  ;;  %1874 = vrcp.f32 %v934_v31  ;;  %v1618_v43 = vpop.f32.mrb[1].mxu1  ;;  %v313_v50 = vadd.f32 %v312_v58, %v103_v6 }
 0x250   :  { %v926_v34 = vrot.slane %v925_v26, 1  ;;  %v946_v38 = vadd.f32 %v945_v27, %v944_v19  ;;  %v938_v37 = vrot.slane %v937_v30, 2  ;;  %v315_v42 = vpop.f32.mrb[2].mxu1 }
 0x251   :  { %v1619_v55 = vpop.f32.mrb[3].mxu1  ;;  %v2334_v31 = vadd.f32 %v315_v42, %v103_v6 }
 0x252   :  { %v927_v28 = vadd.f32 %v926_v34, %v925_v26  ;;  %v947_v16 = vrot.slane %v946_v38, 1  ;;  %v939_v39 = vadd.f32 %v938_v37, %v937_v30  ;;  %1697 = vmatmul.mubr.msk.f32.gmra.mrb[12].mxu1 %vm676_vm1, %v974_v32 }
 0x253   :  { %v1873_v13 = vpop.eup %1872 }
 0x254   :  { %v948_v40 = vadd.f32 %v947_v16, %v946_v38  ;;  %v940_v49 = vrot.slane %v939_v39, 1  ;;  %1876 = vrcp.f32 %v927_v28  ;;  %v975_v4 = vmul.f32 %v1873_v13, %v2280_v36 }
 0x256   :  { %v941_v41 = vadd.f32 %v940_v49, %v939_v39  ;;  %1699 = vmatprep.mubr.msk.f32.mxu1 %vm676_vm1, %v975_v4  ;;  %1878 = vrcp.f32 %v948_v40 }
 0x257   :  { %1700 = vmatmul.mubr.msk.f32.gmra.mrb[14].mxu1 %vm676_vm1, %v976_v29 }
 0x258   :  { %1880 = vrcp.f32 %v941_v41 }
 0x259   :  { %v1875_v7 = vpop.eup %1874 }
 0x25a   :  { %v978_v47 = vmul.f32 %v1875_v7, %v2288_v56  ;;  %v1810_v56 = vld [vmem:[#allocation2] sm:$0xff]  }
 0x25b   :  { %1709 = vmatpush3.bf16.msra.mxu1 %v1810_v56 }
 0x25c   :  { %1710 = vmatprep.subr.bf16.mxu1 %v1939_v61 }
 0x25e   :  { %v1877_v44 = vpop.eup %1876 }
 0x25f   :  { %v977_v46 = vmul.f32 %v1877_v44, %v1857_v1  ;;  %1711 = vmatpush3.bf16.msra.mxu1 %v1811_v57  ;;  %v1817_v1 = vld [vmem:[#allocation2 + $0x38] sm:$0xff]  }
 0x260   :  { %v1879_v52 = vpop.eup %1878  ;;  %1712 = vmatprep.subr.bf16.mxu1 %v1939_v61 }
 0x261   :  { %1702 = vmatprep.mubr.msk.f32.mxu1 %vm676_vm1, %v977_v46  ;;  %v980_v51 = vmul.f32 %v1879_v52, %v1861_v8 }
 0x262   :  { %v1881_v21 = vpop.eup %1880  ;;  %1703 = vmatmul.mubr.msk.f32.gmra.mrb[16].mxu1 %vm676_vm1, %v978_v47 }
 0x263   :  { %v979_v36 = vmul.f32 %v1881_v21, %v1865_v24  ;;  %1713 = vmatpush3.bf16.msra.mxu1 %v1812_v59 }
 0x264   :  { %1714 = vmatprep.subr.bf16.mxu1 %v1939_v61 }
 0x265   :  { %1705 = vmatprep.mubr.msk.f32.mxu1 %vm676_vm1, %v979_v36 }
 0x266   :  { %1706 = vmatmul.mubr.msk.f32.gmra.mrb[18].mxu1 %vm676_vm1, %v980_v51 }
 0x267   :  { %1724 = vmatprep.mubr.msk.bf16.mxu1 %vm1940_vm0, %v1939_v61  ;;  %1715 = vmatpush3.bf16.msra.mxu1 %v1813_v60 }
 0x268   :  { %1716 = vmatprep.subr.bf16.mxu1 %v1939_v61 }
 0x26b   :  { %1717 = vmatpush3.bf16.msra.mxu1 %v1814_v53 }
 0x26c   :  { %1718 = vmatprep.subr.bf16.mxu1 %v1939_v61 }
 0x26f   :  { %1719 = vmatpush3.bf16.msra.mxu1 %v1815_v48 }
 0x270   :  { %1720 = vmatprep.subr.bf16.mxu1 %v1939_v61 }
 0x273   :  { %1721 = vmatpush3.bf16.msra.mxu1 %v1816_v0 }
 0x274   :  { %1722 = vmatprep.subr.bf16.mxu1 %v1939_v61 }
 0x277   :  { %1723 = vmatpush3.bf16.msra.mxu1 %v1817_v1 }
 0x313   :  { %v1686_v8 = vpop.f32.mrb[4].mxu1 }
 0x314   :  { %v1179_v9 = vmul.f32 %v1686_v8, %v313_v50  ;;  %v1099_v62 = vpop.f32.mrb[5].mxu1 }
 0x315   :  { %v1178_v14 = vmul.f32 %v1099_v62, %v313_v50 }
 0x316   :  { %v1200_v10 = vrot.slane %v1179_v9, 4 }
 0x317   :  { %v1194_v11 = vrot.slane %v1178_v14, 4 }
 0x318   :  { %v1201_v12 = vadd.f32 %v1200_v10, %v1179_v9 }
 0x319   :  { %v1689_v63 = vpop.f32.mrb[6].mxu1  ;;  %v1195_v24 = vadd.f32 %v1194_v11, %v1178_v14 }
 0x31a   :  { %v1181_v61 = vmul.f32 %v1689_v63, %v313_v50  ;;  %v1109_v18 = vpop.f32.mrb[7].mxu1  ;;  %v1202_v20 = vrot.slane %v1201_v12, 2 }
 0x31b   :  { %v1180_v15 = vmul.f32 %v1109_v18, %v313_v50  ;;  %v1196_v45 = vrot.slane %v1195_v24, 2 }
 0x31c   :  { %v1212_v33 = vrot.slane %v1181_v61, 4  ;;  %v1203_v2 = vadd.f32 %v1202_v20, %v1201_v12 }
 0x31d   :  { %v1206_v17 = vrot.slane %v1180_v15, 4  ;;  %v1692_v54 = vpop.f32.mrb[8].mxu1  ;;  %v1197_v19 = vadd.f32 %v1196_v45, %v1195_v24 }
 0x31e   :  { %v1213_v22 = vadd.f32 %v1212_v33, %v1181_v61  ;;  %v1183_v23 = vmul.f32 %v1692_v54, %v313_v50  ;;  %v1119_v25 = vpop.f32.mrb[9].mxu1  ;;  %v1204_v26 = vrot.slane %v1203_v2, 1 }
 0x31f   :  { %v1207_v27 = vadd.f32 %v1206_v17, %v1180_v15  ;;  %v1182_v30 = vmul.f32 %v1119_v25, %v313_v50  ;;  %v1198_v34 = vrot.slane %v1197_v19, 1 }
 0x320   :  { %v1214_v38 = vrot.slane %v1213_v22, 2  ;;  %v1224_v37 = vrot.slane %v1183_v23, 4  ;;  %v1205_v32 = vadd.f32 %v1204_v26, %v1203_v2 }
 0x321   :  { %v1208_v28 = vrot.slane %v1207_v27, 2  ;;  %v1218_v16 = vrot.slane %v1182_v30, 4  ;;  %v1695_v39 = vpop.f32.mrb[10].mxu1  ;;  %v1199_v35 = vadd.f32 %v1198_v34, %v1197_v19 }
 0x322   :  { %v1215_v13 = vadd.f32 %v1214_v38, %v1213_v22  ;;  %v1225_v40 = vadd.f32 %v1224_v37, %v1183_v23  ;;  %v1185_v49 = vmul.f32 %v1695_v39, %v313_v50  ;;  %v1129_v4 = vpop.f32.mrb[11].mxu1  ;;  %v1291_v41 = vpack.c.bf16 %v1205_v32, %v1205_v32 }
 0x323   :  { %v1209_v29 = vadd.f32 %v1208_v28, %v1207_v27  ;;  %v1219_v7 = vadd.f32 %v1218_v16, %v1182_v30  ;;  %v1184_v44 = vmul.f32 %v1129_v4, %v313_v50  ;;  %v1290_v46 = vpack.c.bf16 %v1199_v35, %v1199_v35 }
 0x324   :  { %v1216_v47 = vrot.slane %v1215_v13, 1  ;;  %v1226_v52 = vrot.slane %v1225_v40, 2  ;;  %v1236_v21 = vrot.slane %v1185_v49, 4  ;;  %v1346_v36 = vunpack.c.l.b16 %v1291_v41 }
 0x325   :  { %v1210_v51 = vrot.slane %v1209_v29, 1  ;;  %v1220_v58 = vrot.slane %v1219_v7, 2  ;;  %v1230_v43 = vrot.slane %v1184_v44, 4  ;;  %v1698_v42 = vpop.f32.mrb[12].mxu1  ;;  %v1345_v55 = vunpack.c.l.b16 %v1290_v46 }
 0x326   :  { %v1217_v56 = vadd.f32 %v1216_v47, %v1215_v13  ;;  %v1227_v57 = vadd.f32 %v1226_v52, %v1225_v40  ;;  %v1237_v59 = vadd.f32 %v1236_v21, %v1185_v49  ;;  %v1139_v60 = vpop.f32.mrb[13].mxu1  ;;  %v1187_v1 = vmul.f32 %v1698_v42, %v2334_v31 }
 0x327   :  { %v1211_v53 = vadd.f32 %v1210_v51, %v1209_v29  ;;  %v1221_v48 = vadd.f32 %v1220_v58, %v1219_v7  ;;  %v1231_v0 = vadd.f32 %v1230_v43, %v1184_v44  ;;  %v1362_v3 = vsel %vm1361_vm2, %v1346_v36, %v1345_v55 }
 0x328   :  { %v1293_v5 = vpack.c.bf16 %v1217_v56, %v1217_v56  ;;  %v1228_v6 = vrot.slane %v1227_v57, 1  ;;  %v1238_v50 = vrot.slane %v1237_v59, 2  ;;  %v1248_v14 = vrot.slane %v1187_v1, 4 }
 0x329   :  { %v1292_v8 = vpack.c.bf16 %v1211_v53, %v1211_v53  ;;  %v1222_v9 = vrot.slane %v1221_v48, 1  ;;  %v1232_v62 = vrot.slane %v1231_v0, 2  ;;  %v1186_v63 = vmul.f32 %v1139_v60, %v2334_v31 }
 0x32a   :  { %v1348_v10 = vunpack.c.l.b16 %v1293_v5  ;;  %v1229_v11 = vadd.f32 %v1228_v6, %v1227_v57  ;;  %v1239_v12 = vadd.f32 %v1238_v50, %v1237_v59  ;;  %v1249_v20 = vadd.f32 %v1248_v14, %v1187_v1  ;;  %v1701_v15 = vpop.f32.mrb[14].mxu1 }
 0x32b   :  { %v1347_v24 = vunpack.c.l.b16 %v1292_v8  ;;  %v1223_v61 = vadd.f32 %v1222_v9, %v1221_v48  ;;  %v1233_v18 = vadd.f32 %v1232_v62, %v1231_v0  ;;  %v1242_v2 = vrot.slane %v1186_v63, 4  ;;  %v1149_v54 = vpop.f32.mrb[15].mxu1 }
 0x32c   :  { %v1295_v45 = vpack.c.bf16 %v1229_v11, %v1229_v11  ;;  %v1240_v33 = vrot.slane %v1239_v12, 1  ;;  %v1189_v17 = vmul.f32 %v1701_v15, %v2334_v31  ;;  %v1250_v25 = vrot.slane %v1249_v20, 2 }
 0x32d   :  { %v1364_v19 = vsel %vm1363_vm3, %v1347_v24, %v1362_v3  ;;  %v1294_v22 = vpack.c.bf16 %v1223_v61, %v1223_v61  ;;  %v1234_v23 = vrot.slane %v1233_v18, 1  ;;  %v1243_v30 = vadd.f32 %v1242_v2, %v1186_v63 }
 0x32e   :  { %v1366_v26 = vsel %vm1365_vm4, %v1348_v10, %v1364_v19  ;;  %v1241_v27 = vadd.f32 %v1240_v33, %v1239_v12  ;;  %v1251_v37 = vadd.f32 %v1250_v25, %v1249_v20  ;;  %v1260_v32 = vrot.slane %v1189_v17, 4 }
 0x32f   :  { %v1349_v34 = vunpack.c.l.b16 %v1294_v22  ;;  %v1235_v38 = vadd.f32 %v1234_v23, %v1233_v18  ;;  %v1350_v28 = vunpack.c.l.b16 %v1295_v45  ;;  %v1244_v39 = vrot.slane %v1243_v30, 2 }
 0x330   :  { %v1297_v16 = vpack.c.bf16 %v1241_v27, %v1241_v27  ;;  %v1188_v35 = vmul.f32 %v1149_v54, %v2334_v31  ;;  %v1252_v49 = vrot.slane %v1251_v37, 1  ;;  %v1261_v4 = vadd.f32 %v1260_v32, %v1189_v17 }
 0x331   :  { %v1368_v13 = vsel %vm1367_vm5, %v1349_v34, %v1366_v26  ;;  %v1296_v40 = vpack.c.bf16 %v1235_v38, %v1235_v38  ;;  %v1245_v29 = vadd.f32 %v1244_v39, %v1243_v30 }
 0x332   :  { %v1370_v41 = vsel %vm1369_vm6, %v1350_v28, %v1368_v13  ;;  %v1254_v7 = vrot.slane %v1188_v35, 4  ;;  %v1253_v46 = vadd.f32 %v1252_v49, %v1251_v37  ;;  %v1262_v47 = vrot.slane %v1261_v4, 2 }
 0x333   :  { %v1351_v44 = vunpack.c.l.b16 %v1296_v40  ;;  %v1352_v52 = vunpack.c.l.b16 %v1297_v16  ;;  %v1246_v21 = vrot.slane %v1245_v29, 1 }
 0x334   :  { %v1255_v36 = vadd.f32 %v1254_v7, %v1188_v35  ;;  %v1299_v58 = vpack.c.bf16 %v1253_v46, %v1253_v46  ;;  %v1263_v43 = vadd.f32 %v1262_v47, %v1261_v4 }
 0x335   :  { %v1372_v51 = vsel %vm1371_vm7, %v1351_v44, %v1370_v41  ;;  %v1704_v42 = vpop.f32.mrb[16].mxu1  ;;  %v1247_v55 = vadd.f32 %v1246_v21, %v1245_v29 }
 0x336   :  { %v1256_v56 = vrot.slane %v1255_v36, 2  ;;  %v1191_v57 = vmul.f32 %v1704_v42, %v2334_v31  ;;  %v1159_v59 = vpop.f32.mrb[17].mxu1  ;;  %v1374_v60 = vsel %vm1373_vm8, %v1352_v52, %v1372_v51  ;;  %v1264_v53 = vrot.slane %v1263_v43, 1 }
 0x337   :  { %v1190_v48 = vmul.f32 %v1159_v59, %v2334_v31  ;;  %v1354_v0 = vunpack.c.l.b16 %v1299_v58  ;;  %v1298_v1 = vpack.c.bf16 %v1247_v55, %v1247_v55 }
 0x338   :  { %v1257_v3 = vadd.f32 %v1256_v56, %v1255_v36  ;;  %v1272_v5 = vrot.slane %v1191_v57, 4  ;;  %v1265_v6 = vadd.f32 %v1264_v53, %v1263_v43  ;;  %v1521_v43 = vld [vmem:[%s2371_s4] ss:$0 sm:$0xff] }
 0x339   :  { %v1266_v50 = vrot.slane %v1190_v48, 4  ;;  %v1707_v8 = vpop.f32.mrb[18].mxu1  ;;  %v1353_v9 = vunpack.c.l.b16 %v1298_v1 }
 0x33a   :  { %v1258_v62 = vrot.slane %v1257_v3, 1  ;;  %v1273_v14 = vadd.f32 %v1272_v5, %v1191_v57  ;;  %v1193_v10 = vmul.f32 %v1707_v8, %v2334_v31  ;;  %v1169_v11 = vpop.f32.mrb[19].mxu1  ;;  %v1301_v15 = vpack.c.bf16 %v1265_v6, %v1265_v6 }
 0x33b   :  { %v1267_v12 = vadd.f32 %v1266_v50, %v1190_v48  ;;  %v1192_v63 = vmul.f32 %v1169_v11, %v2334_v31  ;;  %v1375_v24 = vsel %vm1361_vm2, %v1354_v0, %v1353_v9 }
 0x33c   :  { %v1259_v61 = vadd.f32 %v1258_v62, %v1257_v3  ;;  %v1274_v18 = vrot.slane %v1273_v14, 2  ;;  %v1284_v20 = vrot.slane %v1193_v10, 4  ;;  %v1356_v27 = vunpack.c.l.b16 %v1301_v15 }
 0x33d   :  { %v1268_v45 = vrot.slane %v1267_v12, 2  ;;  %v1278_v33 = vrot.slane %v1192_v63, 4 }
 0x33e   :  { %v1300_v2 = vpack.c.bf16 %v1259_v61, %v1259_v61  ;;  %v1275_v17 = vadd.f32 %v1274_v18, %v1273_v14  ;;  %v1285_v54 = vadd.f32 %v1284_v20, %v1193_v10 }
 0x33f   :  { %v1269_v19 = vadd.f32 %v1268_v45, %v1267_v12  ;;  %v1279_v22 = vadd.f32 %v1278_v33, %v1192_v63 }
 0x340   :  { %v1355_v23 = vunpack.c.l.b16 %v1300_v2  ;;  %v1276_v25 = vrot.slane %v1275_v17, 1  ;;  %v1286_v26 = vrot.slane %v1285_v54, 2 }
 0x341   :  { %v1270_v30 = vrot.slane %v1269_v19, 1  ;;  %v1280_v34 = vrot.slane %v1279_v22, 2 }
 0x342   :  { %v1376_v31 = vsel %vm1363_vm3, %v1355_v23, %v1375_v24  ;;  %v1277_v38 = vadd.f32 %v1276_v25, %v1275_v17  ;;  %v1287_v37 = vadd.f32 %v1286_v26, %v1285_v54 }
 0x343   :  { %v1271_v32 = vadd.f32 %v1270_v30, %v1269_v19  ;;  %v1377_v28 = vsel %vm1365_vm4, %v1356_v27, %v1376_v31  ;;  %v1281_v16 = vadd.f32 %v1280_v34, %v1279_v22 }
 0x344   :  { %v1303_v39 = vpack.c.bf16 %v1277_v38, %v1277_v38  ;;  %v1288_v35 = vrot.slane %v1287_v37, 1 }
 0x345   :  { %v1302_v13 = vpack.c.bf16 %v1271_v32, %v1271_v32  ;;  %v1282_v40 = vrot.slane %v1281_v16, 1 }
 0x346   :  { %v1289_v49 = vadd.f32 %v1288_v35, %v1287_v37  ;;  %v1358_v29 = vunpack.c.l.b16 %v1303_v39 }
 0x347   :  { %v1357_v4 = vunpack.c.l.b16 %v1302_v13  ;;  %v1283_v41 = vadd.f32 %v1282_v40, %v1281_v16 }
 0x348   :  { %v1305_v7 = vpack.c.bf16 %v1289_v49, %v1289_v49 }
 0x349   :  { %v1378_v44 = vsel %vm1367_vm5, %v1357_v4, %v1377_v28  ;;  %v1304_v46 = vpack.c.bf16 %v1283_v41, %v1283_v41 }
 0x34a   :  { %v1379_v47 = vsel %vm1369_vm6, %v1358_v29, %v1378_v44  ;;  %v1360_v21 = vunpack.c.l.b16 %v1305_v7 }
 0x34b   :  { %v1359_v52 = vunpack.c.l.b16 %v1304_v46 }
 0x34d   :  { %v1380_v36 = vsel %vm1371_vm7, %v1359_v52, %v1379_v47 }
 0x34e   :  { %v1381_v51 = vsel %vm1373_vm8, %v1360_v21, %v1380_v36 }
 0x34f   :  { %v1382_v58 = vpack.c.b16 %v1381_v51, %v1374_v60 }
 0x351   :  { %1725 = vmatmul.mubr.bf16.vlgmr.msra.gmra.mrb[20].mxu1 %v1382_v58 }
 0x424   :  { %v1466_v42 = vpop.f32.mrb[20].mxu1 }
 0x425   :  { %v1467_v55 = vadd.f32 %v1521_v43, %v1466_v42  ;;  %v1726_v56 = vpop.f32.mrb[21].mxu1 }
 0x426   :  { %v1469_v57 = vpop.f32.mrb[22].mxu1 }
 0x427   :  { %1473 = vst [vmem:[%s2374_s7] sm:$0xff] %v1467_v55  ;;  %v1470_v59 = vadd.f32 %v1521_v43, %v1469_v57  ;;  %v1727_v53 = vpop.f32.mrb[23].mxu1 }
 0x429   :  { %1474 = vst [vmem:[%s2374_s7 + $0x8] sm:$0xff] %v1470_v59 }
 0x42a   :  { %1479 = vsyncpa [#allocation3], 1 }
 0x42b   :  { %1480 = vsyncpa [#allocation5], 1 }

</bundles_post_ra>
